<compile_context>
chip_gen: v7x
topology: tpu7x:2x2x1
jax: 0.10.0
libtpu: 0.0.40
codegen_flags: <defaults>
</compile_context>

<pallas_src>
import jax
import jax.numpy as jnp
import numpy as np
from jax.experimental import pallas as pl
from jax.experimental.pallas import tpu as pltpu


def _round_up(x, m):
    return (x + m - 1) // m * m


def _vmem_bytes(shape, dtype):
    """Conservative VMEM footprint of one buffer (minor two dims padded to the
    native (sublane, 128-lane) tile; sublanes scale with dtype packing)."""
    itemsize = jnp.dtype(dtype).itemsize
    dims = list(shape)
    if not dims:
        return 4
    dims[-1] = _round_up(dims[-1], 128)
    if len(dims) >= 2:
        dims[-2] = _round_up(dims[-2], 8 * max(1, 4 // itemsize))
    total = 1
    for d in dims:
        total *= d
    return total * itemsize


def _vmem_budget_bytes():
    """~75% of physical VMEM => ~96 MiB on v5e/v6e, ~48 MiB on v7x."""
    try:
        phys = int(pltpu.get_tpu_info().vmem_capacity_bytes)
    except Exception:
        phys = 64 << 20          # conservative fallback, safe on every gen
    return (phys * 3) // 4


def _pick_tile_b(batch, cin, cout, m, k, in_dtype, out_dtype, budget):
    """Largest divisor of `batch` whose REAL pipelined footprint
    (2 x double-buffered in/out/param blocks + the column scratch) fits the
    generation-aware VMEM budget, while keeping >= min(batch, 4) grid steps so
    dual TensorCores (v7x) and DMA/compute pipelining stay busy."""
    min_steps = min(batch, 4)
    best = None
    for cand in range(1, batch + 1):
        if batch % cand:
            continue
        if batch // cand < min_steps:
            break
        n = cand * m
        foot = (2 * (_vmem_bytes((cin, n), in_dtype)             # activations
                     + _vmem_bytes((2, n), jnp.int32)            # (h, w) positions
                     + _vmem_bytes((cand, cout, m), out_dtype)   # output block
                     + _vmem_bytes((cout, k), jnp.float32)       # folded weights
                     + _vmem_bytes((cout, 1), jnp.float32))      # folded bias
                + _vmem_bytes((k, n), jnp.float32))              # col scratch (1x)
        if foot <= budget:
            best = cand
    if best is None:
        raise ValueError("even a single-sample block overflows the VMEM budget; "
                         "H*W is too large -- add spatial tiling to the grid")
    return best


def _make_conv_bn_relu_kernel(H, W):
    """Fused 3x3-conv(pad=1) + folded-BN(eval) + ReLU over one batch chunk."""
    M = H * W

    def kernel(x_ref, pos_ref, w_ref, b_ref, o_ref, cols_ref):
        # x_ref   : (Cin, N)          lane-dense activations, N = tile_b*H*W
        # pos_ref : (2, N) int32      per-lane (h, w) position (halo masks)
        # w_ref   : (Cout, K) f32     conv weight with BN scale folded, K = 9*Cin
        # b_ref   : (Cout, 1) f32     folded BN bias
        # o_ref   : (tile_b, Cout, M) NCHW-flat output chunk
        # cols_ref: (K, N) f32 VMEM scratch -- in-kernel im2col
        cin = x_ref.shape[0]
        n = x_ref.shape[1]
        tile_b = o_ref.shape[0]

        x = x_ref[...].astype(jnp.float32)     # bf16 HBM stream -> f32 regs
        hpos = pos_ref[0:1, :]
        wpos = pos_ref[1:2, :]

        # Assemble the column matrix: 9 shifted + masked copies of x.  The roll
        # is circular over the whole (b, h, w)-flattened lane axis; every
        # wrapped / cross-sample / out-of-image lane is exactly a padding
        # position and is zeroed by the mask, so no halo DMA and no 9x HBM
        # im2col tensor is ever materialized.
        for kh in range(3):
            for kw in range(3):
                dh, dw = kh - 1, kw - 1
                if dh == 0 and dw == 0:
                    tap = x
                else:
                    shift = (-(dh * W + dw)) % n
                    tap = pltpu.roll(x, shift=shift, axis=1)
                    valid = None
                    if dh < 0:
                        valid = hpos >= -dh
                    elif dh > 0:
                        valid = hpos < H - dh
                    if dw != 0:
                        vw = (wpos >= -dw) if dw < 0 else (wpos < W - dw)
                        valid = vw if valid is None else jnp.logical_and(valid, vw)
                    tap = jnp.where(valid, tap, 0.0)
                cols_ref[pl.ds((kh * 3 + kw) * cin, cin), :] = tap

        # ONE wide MXU matmul per grid step, f32 accumulation.
        acc = jnp.dot(w_ref[...], cols_ref[...],
                      preferred_element_type=jnp.float32)          # (Cout, N)
        # Folded-BN epilogue (scale already inside w_ref): + bias, ReLU.
        # Hoisted: computed once for the whole chunk, no per-sample broadcasts.
        y = jnp.maximum(acc + b_ref[...], 0.0).astype(o_ref.dtype)
        # "Gather": lane-aligned (Cout, M) slabs back into NCHW-flat layout.
        for b in range(tile_b):
            o_ref[b] = y[:, b * M:(b + 1) * M]

    return kernel


def data_parallel_conv_bn_relu(x_nchw, w, conv_b, gamma, beta, run_mean,
                               run_var, eps=1e-5,
                               compute_dtype=jnp.bfloat16,
                               out_dtype=jnp.float32):
    """Emulates _DataParallel(Conv2d(3x3,pad=1)->BN2d(eval)->ReLU).forward(x).

    x_nchw: (B, Cin, H, W); w: (3, 3, Cin, Cout) HWIO.  Returns (B, Cout, H, W).
    compute_dtype controls the activation HBM stream (bf16 halves the dominant
    stream); out_dtype controls the output stream (pass bf16 for max BW).
    """
    B, Cin, H, W = x_nchw.shape
    Cout = w.shape[3]
    M = H * W
    K = 9 * Cin

    # ---- wrapper glue: BN/weight folding (tiny) + activation layout --------
    scale = gamma / jnp.sqrt(run_var + eps)                               # (Cout,)
    w_t = jnp.transpose(w, (3, 0, 1, 2)).reshape(Cout, K)
    w_folded = (w_t * scale[:, None]).astype(jnp.float32)                 # scale folded
    bias = (beta + (conv_b - run_mean) * scale).reshape(Cout, 1).astype(jnp.float32)

    # Lane-dense column layout (Cin, B*H*W): a single pass that fuses with the
    # bf16 cast, replacing the 9x-inflated HBM im2col of the previous version.
    # In a real pipeline the previous layer would already emit this layout.
    x_cols = jnp.transpose(x_nchw.reshape(B, Cin, M), (1, 0, 2))
    x_cols = x_cols.reshape(Cin, B * M).astype(compute_dtype)

    # Per-lane (h, w) positions for the 3x3 halo masks; precomputed so the
    # kernel needs no vector integer div/mod.  Negligible next to the
    # activation stream for real channel counts.
    hh = np.repeat(np.arange(H, dtype=np.int32), W)
    ww = np.tile(np.arange(W, dtype=np.int32), H)
    pos = jnp.asarray(np.stack([np.tile(hh, B), np.tile(ww, B)], axis=0))  # (2, B*M)

    # ---- generation-aware tiling / VMEM budgeting ---------------------------
    budget = _vmem_budget_bytes()
    tile_b = _pick_tile_b(B, Cin, Cout, M, K, x_cols.dtype, out_dtype, budget)
    grid = (B // tile_b,)
    N = tile_b * M

    out_itemsize = jnp.dtype(out_dtype).itemsize
    cost = pl.CostEstimate(
        flops=2 * B * M * K * Cout,
        transcendentals=0,
        bytes_accessed=(x_cols.size * x_cols.dtype.itemsize
                        + pos.size * 4
                        + Cout * K * 4 + Cout * 4
                        + B * Cout * M * out_itemsize))

    out = pl.pallas_call(
        _make_conv_bn_relu_kernel(H, W),
        out_shape=jax.ShapeDtypeStruct((B, Cout, M), out_dtype),
        grid_spec=pltpu.PrefetchScalarGridSpec(
            num_scalar_prefetch=0,
            grid=grid,                                        # scatter: one step / chunk
            in_specs=[
                pl.BlockSpec((Cin, N), lambda i: (0, i)),     # activations
                pl.BlockSpec((2, N), lambda i: (0, i)),       # (h, w) positions
                pl.BlockSpec((Cout, K), lambda i: (0, 0)),    # replicated weights
                pl.BlockSpec((Cout, 1), lambda i: (0, 0)),    # replicated bias
            ],
            out_specs=pl.BlockSpec((tile_b, Cout, M), lambda i: (i, 0, 0)),
            scratch_shapes=[pltpu.VMEM((K, N), jnp.float32)],
        ),
        compiler_params=pltpu.CompilerParams(
            dimension_semantics=("parallel",),                # megacore-shardable
            vmem_limit_bytes=int(budget)),
        cost_estimate=cost,
    )(x_cols, pos, w_folded, bias)

    # M = 256 here is a multiple of 128 so every store is an unmasked vst; for
    # feature maps with H*W % 128 != 0, pad M (or emit a (Cout, B*M) layout).
    return out.reshape(B, Cout, H, W)       # free reshape: already NCHW-ordered


def _reference(x_nchw, w, conv_b, gamma, beta, run_mean, run_var, eps=1e-5):
    """Pure-JAX reference (lax conv) for the correctness check."""
    x = jnp.transpose(x_nchw, (0, 2, 3, 1))
    y = jax.lax.conv_general_dilated(
        x, w, window_strides=(1, 1), padding="SAME",
        dimension_numbers=("NHWC", "HWIO", "NHWC"))
    y = y + conv_b
    y = (y - run_mean) / jnp.sqrt(run_var + eps) * gamma + beta
    y = jnp.maximum(y, 0.0)
    return jnp.transpose(y, (0, 3, 1, 2))


if __name__ == "__main__":
    # small shapes: batch=2 (== 2 "devices", chunk_size 1 each -> grid of 2
    # parallel steps), Cin=4, Cout=8, spatial 16x16
    B, Cin, Cout, H, W = 2, 4, 8, 16, 16

    key = jax.random.PRNGKey(0)
    kx, kw_, kb, kg, kbe, km, kv = jax.random.split(key, 7)

    x = jax.random.normal(kx, (B, Cin, H, W), dtype=jnp.float32)
    w = jax.random.normal(kw_, (3, 3, Cin, Cout), dtype=jnp.float32) * 0.1
    conv_b = jax.random.normal(kb, (Cout,), dtype=jnp.float32) * 0.1
    gamma = 1.0 + 0.1 * jax.random.normal(kg, (Cout,), dtype=jnp.float32)
    beta = 0.1 * jax.random.normal(kbe, (Cout,), dtype=jnp.float32)
    run_mean = 0.1 * jax.random.normal(km, (Cout,), dtype=jnp.float32)
    run_var = jnp.abs(jax.random.normal(kv, (Cout,), dtype=jnp.float32)) + 0.5

    ref = _reference(x, w, conv_b, gamma, beta, run_mean, run_var)

    # exact path: f32 streams end-to-end -> tight tolerance vs lax.conv
    out_f32 = data_parallel_conv_bn_relu(
        x, w, conv_b, gamma, beta, run_mean, run_var,
        compute_dtype=jnp.float32, out_dtype=jnp.float32)
    out_f32 = jax.block_until_ready(out_f32)
    np.testing.assert_allclose(np.asarray(out_f32), np.asarray(ref),
                               rtol=1e-4, atol=1e-4)

    # production path: bf16 activation stream (tolerance covers bf16 input
    # quantization; accumulation and the BN/ReLU epilogue stay f32)
    out_bf = data_parallel_conv_bn_relu(
        x, w, conv_b, gamma, beta, run_mean, run_var)
    out_bf = jax.block_until_ready(out_bf)
    np.testing.assert_allclose(np.asarray(out_bf), np.asarray(ref),
                               rtol=5e-2, atol=5e-2)

    print("KERNEL_OK")
</pallas_src>

<mosaic_0001>
module attributes {stable_mosaic.version = 11 : i64} {
  func.func @kernel(%arg0: i32, %arg1: memref<4x256xf32, #tpu.memory_space<vmem>>, %arg2: memref<2x256xi32, #tpu.memory_space<vmem>>, %arg3: memref<8x36xf32, #tpu.memory_space<vmem>>, %arg4: memref<8x1xf32, #tpu.memory_space<vmem>>, %arg5: memref<1x8x256xf32, #tpu.memory_space<vmem>>, %arg6: memref<36x256xf32, #tpu.memory_space<vmem>>) attributes {dimension_semantics = [#tpu.dimension_semantics<parallel>], iteration_bounds = array<i64: 2>, scalar_prefetch = 0 : i64, scratch_operands = 1 : i64, tpu.core_type = #tpu.core_type<tc>, window_params = [{transform_indices = @transform_0, window_bounds = array<i64: 4, 256>}, {transform_indices = @transform_1, window_bounds = array<i64: 2, 256>}, {pipeline_mode = #tpu.pipeline_mode<synchronous>, transform_indices = @transform_2, window_bounds = array<i64: 8, 36>}, {pipeline_mode = #tpu.pipeline_mode<synchronous>, transform_indices = @transform_3, window_bounds = array<i64: 8, 1>}, {transform_indices = @transform_4, window_bounds = array<i64: 1, 8, 256>}]} {
    %c0 = arith.constant 0 : index
    %c0_0 = arith.constant 0 : index
    %0 = vector.load %arg1[%c0, %c0_0] : memref<4x256xf32, #tpu.memory_space<vmem>>, vector<4x256xf32>
    %c0_1 = arith.constant 0 : index
    %c0_2 = arith.constant 0 : index
    %1 = vector.load %arg2[%c0_1, %c0_2] : memref<2x256xi32, #tpu.memory_space<vmem>>, vector<1x256xi32>
    %c1 = arith.constant 1 : index
    %c0_3 = arith.constant 0 : index
    %2 = vector.load %arg2[%c1, %c0_3] : memref<2x256xi32, #tpu.memory_space<vmem>>, vector<1x256xi32>
    %c17_i32 = arith.constant 17 : i32
    %3 = tpu.dynamic_rotate %0 by %c17_i32 dim 1 : vector<4x256xf32>, i32 -> vector<4x256xf32>
    %c1_i32 = arith.constant 1 : i32
    %4 = vector.broadcast %c1_i32 : i32 to vector<1x256xi32>
    %5 = arith.cmpi sge, %1, %4 : vector<1x256xi32>
    %c1_i32_4 = arith.constant 1 : i32
    %6 = vector.broadcast %c1_i32_4 : i32 to vector<1x256xi32>
    %7 = arith.cmpi sge, %2, %6 : vector<1x256xi32>
    %8 = arith.andi %5, %7 : vector<1x256xi1>
    %cst = arith.constant 0.000000e+00 : f32
    %9 = vector.shape_cast %8 : vector<1x256xi1> to vector<1x256xi1>
    %10 = vector.broadcast %9 : vector<1x256xi1> to vector<4x256xi1>
    %11 = vector.broadcast %cst : f32 to vector<4x256xf32>
    %12 = arith.select %10, %3, %11 : vector<4x256xi1>, vector<4x256xf32>
    %c0_5 = arith.constant 0 : index
    %c0_6 = arith.constant 0 : index
    %13 = vector.load %arg6[%c0_5, %c0_6] : memref<36x256xf32, #tpu.memory_space<vmem>>, vector<4x256xf32>
    tpu.vector_store %arg6[%c0_5, %c0_6], %12 {strides = array<i32>} : memref<36x256xf32, #tpu.memory_space<vmem>>, vector<4x256xf32>,
    %c16_i32 = arith.constant 16 : i32
    %14 = tpu.dynamic_rotate %0 by %c16_i32 dim 1 : vector<4x256xf32>, i32 -> vector<4x256xf32>
    %c1_i32_7 = arith.constant 1 : i32
    %15 = vector.broadcast %c1_i32_7 : i32 to vector<1x256xi32>
    %16 = arith.cmpi sge, %1, %15 : vector<1x256xi32>
    %cst_8 = arith.constant 0.000000e+00 : f32
    %17 = vector.shape_cast %16 : vector<1x256xi1> to vector<1x256xi1>
    %18 = vector.broadcast %17 : vector<1x256xi1> to vector<4x256xi1>
    %19 = vector.broadcast %cst_8 : f32 to vector<4x256xf32>
    %20 = arith.select %18, %14, %19 : vector<4x256xi1>, vector<4x256xf32>
    %c4 = arith.constant 4 : index
    %c0_9 = arith.constant 0 : index
    %21 = vector.load %arg6[%c4, %c0_9] : memref<36x256xf32, #tpu.memory_space<vmem>>, vector<4x256xf32>
    tpu.vector_store %arg6[%c4, %c0_9], %20 {strides = array<i32>} : memref<36x256xf32, #tpu.memory_space<vmem>>, vector<4x256xf32>,
    %c15_i32 = arith.constant 15 : i32
    %22 = tpu.dynamic_rotate %0 by %c15_i32 dim 1 : vector<4x256xf32>, i32 -> vector<4x256xf32>
    %c1_i32_10 = arith.constant 1 : i32
    %23 = vector.broadcast %c1_i32_10 : i32 to vector<1x256xi32>
    %24 = arith.cmpi sge, %1, %23 : vector<1x256xi32>
    %c15_i32_11 = arith.constant 15 : i32
    %25 = vector.broadcast %c15_i32_11 : i32 to vector<1x256xi32>
    %26 = arith.cmpi slt, %2, %25 : vector<1x256xi32>
    %27 = arith.andi %24, %26 : vector<1x256xi1>
    %cst_12 = arith.constant 0.000000e+00 : f32
    %28 = vector.shape_cast %27 : vector<1x256xi1> to vector<1x256xi1>
    %29 = vector.broadcast %28 : vector<1x256xi1> to vector<4x256xi1>
    %30 = vector.broadcast %cst_12 : f32 to vector<4x256xf32>
    %31 = arith.select %29, %22, %30 : vector<4x256xi1>, vector<4x256xf32>
    %c8 = arith.constant 8 : index
    %c0_13 = arith.constant 0 : index
    %32 = vector.load %arg6[%c8, %c0_13] : memref<36x256xf32, #tpu.memory_space<vmem>>, vector<4x256xf32>
    tpu.vector_store %arg6[%c8, %c0_13], %31 {strides = array<i32>} : memref<36x256xf32, #tpu.memory_space<vmem>>, vector<4x256xf32>,
    %c1_i32_14 = arith.constant 1 : i32
    %33 = tpu.dynamic_rotate %0 by %c1_i32_14 dim 1 : vector<4x256xf32>, i32 -> vector<4x256xf32>
    %c1_i32_15 = arith.constant 1 : i32
    %34 = vector.broadcast %c1_i32_15 : i32 to vector<1x256xi32>
    %35 = arith.cmpi sge, %2, %34 : vector<1x256xi32>
    %cst_16 = arith.constant 0.000000e+00 : f32
    %36 = vector.shape_cast %35 : vector<1x256xi1> to vector<1x256xi1>
    %37 = vector.broadcast %36 : vector<1x256xi1> to vector<4x256xi1>
    %38 = vector.broadcast %cst_16 : f32 to vector<4x256xf32>
    %39 = arith.select %37, %33, %38 : vector<4x256xi1>, vector<4x256xf32>
    %c12 = arith.constant 12 : index
    %c0_17 = arith.constant 0 : index
    %40 = vector.load %arg6[%c12, %c0_17] : memref<36x256xf32, #tpu.memory_space<vmem>>, vector<4x256xf32>
    tpu.vector_store %arg6[%c12, %c0_17], %39 {strides = array<i32>} : memref<36x256xf32, #tpu.memory_space<vmem>>, vector<4x256xf32>,
    %c16 = arith.constant 16 : index
    %c0_18 = arith.constant 0 : index
    %41 = vector.load %arg6[%c16, %c0_18] : memref<36x256xf32, #tpu.memory_space<vmem>>, vector<4x256xf32>
    tpu.vector_store %arg6[%c16, %c0_18], %0 {strides = array<i32>} : memref<36x256xf32, #tpu.memory_space<vmem>>, vector<4x256xf32>,
    %c255_i32 = arith.constant 255 : i32
    %42 = tpu.dynamic_rotate %0 by %c255_i32 dim 1 : vector<4x256xf32>, i32 -> vector<4x256xf32>
    %c15_i32_19 = arith.constant 15 : i32
    %43 = vector.broadcast %c15_i32_19 : i32 to vector<1x256xi32>
    %44 = arith.cmpi slt, %2, %43 : vector<1x256xi32>
    %cst_20 = arith.constant 0.000000e+00 : f32
    %45 = vector.shape_cast %44 : vector<1x256xi1> to vector<1x256xi1>
    %46 = vector.broadcast %45 : vector<1x256xi1> to vector<4x256xi1>
    %47 = vector.broadcast %cst_20 : f32 to vector<4x256xf32>
    %48 = arith.select %46, %42, %47 : vector<4x256xi1>, vector<4x256xf32>
    %c20 = arith.constant 20 : index
    %c0_21 = arith.constant 0 : index
    %49 = vector.load %arg6[%c20, %c0_21] : memref<36x256xf32, #tpu.memory_space<vmem>>, vector<4x256xf32>
    tpu.vector_store %arg6[%c20, %c0_21], %48 {strides = array<i32>} : memref<36x256xf32, #tpu.memory_space<vmem>>, vector<4x256xf32>,
    %c241_i32 = arith.constant 241 : i32
    %50 = tpu.dynamic_rotate %0 by %c241_i32 dim 1 : vector<4x256xf32>, i32 -> vector<4x256xf32>
    %c15_i32_22 = arith.constant 15 : i32
    %51 = vector.broadcast %c15_i32_22 : i32 to vector<1x256xi32>
    %52 = arith.cmpi slt, %1, %51 : vector<1x256xi32>
    %c1_i32_23 = arith.constant 1 : i32
    %53 = vector.broadcast %c1_i32_23 : i32 to vector<1x256xi32>
    %54 = arith.cmpi sge, %2, %53 : vector<1x256xi32>
    %55 = arith.andi %52, %54 : vector<1x256xi1>
    %cst_24 = arith.constant 0.000000e+00 : f32
    %56 = vector.shape_cast %55 : vector<1x256xi1> to vector<1x256xi1>
    %57 = vector.broadcast %56 : vector<1x256xi1> to vector<4x256xi1>
    %58 = vector.broadcast %cst_24 : f32 to vector<4x256xf32>
    %59 = arith.select %57, %50, %58 : vector<4x256xi1>, vector<4x256xf32>
    %c24 = arith.constant 24 : index
    %c0_25 = arith.constant 0 : index
    %60 = vector.load %arg6[%c24, %c0_25] : memref<36x256xf32, #tpu.memory_space<vmem>>, vector<4x256xf32>
    tpu.vector_store %arg6[%c24, %c0_25], %59 {strides = array<i32>} : memref<36x256xf32, #tpu.memory_space<vmem>>, vector<4x256xf32>,
    %c240_i32 = arith.constant 240 : i32
    %61 = tpu.dynamic_rotate %0 by %c240_i32 dim 1 : vector<4x256xf32>, i32 -> vector<4x256xf32>
    %c15_i32_26 = arith.constant 15 : i32
    %62 = vector.broadcast %c15_i32_26 : i32 to vector<1x256xi32>
    %63 = arith.cmpi slt, %1, %62 : vector<1x256xi32>
    %cst_27 = arith.constant 0.000000e+00 : f32
    %64 = vector.shape_cast %63 : vector<1x256xi1> to vector<1x256xi1>
    %65 = vector.broadcast %64 : vector<1x256xi1> to vector<4x256xi1>
    %66 = vector.broadcast %cst_27 : f32 to vector<4x256xf32>
    %67 = arith.select %65, %61, %66 : vector<4x256xi1>, vector<4x256xf32>
    %c28 = arith.constant 28 : index
    %c0_28 = arith.constant 0 : index
    %68 = vector.load %arg6[%c28, %c0_28] : memref<36x256xf32, #tpu.memory_space<vmem>>, vector<4x256xf32>
    tpu.vector_store %arg6[%c28, %c0_28], %67 {strides = array<i32>} : memref<36x256xf32, #tpu.memory_space<vmem>>, vector<4x256xf32>,
    %c239_i32 = arith.constant 239 : i32
    %69 = tpu.dynamic_rotate %0 by %c239_i32 dim 1 : vector<4x256xf32>, i32 -> vector<4x256xf32>
    %c15_i32_29 = arith.constant 15 : i32
    %70 = vector.broadcast %c15_i32_29 : i32 to vector<1x256xi32>
    %71 = arith.cmpi slt, %1, %70 : vector<1x256xi32>
    %c15_i32_30 = arith.constant 15 : i32
    %72 = vector.broadcast %c15_i32_30 : i32 to vector<1x256xi32>
    %73 = arith.cmpi slt, %2, %72 : vector<1x256xi32>
    %74 = arith.andi %71, %73 : vector<1x256xi1>
    %cst_31 = arith.constant 0.000000e+00 : f32
    %75 = vector.shape_cast %74 : vector<1x256xi1> to vector<1x256xi1>
    %76 = vector.broadcast %75 : vector<1x256xi1> to vector<4x256xi1>
    %77 = vector.broadcast %cst_31 : f32 to vector<4x256xf32>
    %78 = arith.select %76, %69, %77 : vector<4x256xi1>, vector<4x256xf32>
    %c32 = arith.constant 32 : index
    %c0_32 = arith.constant 0 : index
    %79 = vector.load %arg6[%c32, %c0_32] : memref<36x256xf32, #tpu.memory_space<vmem>>, vector<4x256xf32>
    tpu.vector_store %arg6[%c32, %c0_32], %78 {strides = array<i32>} : memref<36x256xf32, #tpu.memory_space<vmem>>, vector<4x256xf32>,
    %c0_33 = arith.constant 0 : index
    %c0_34 = arith.constant 0 : index
    %80 = vector.load %arg3[%c0_33, %c0_34] : memref<8x36xf32, #tpu.memory_space<vmem>>, vector<8x36xf32>
    %c0_35 = arith.constant 0 : index
    %c0_36 = arith.constant 0 : index
    %81 = vector.load %arg6[%c0_35, %c0_36] : memref<36x256xf32, #tpu.memory_space<vmem>>, vector<36x256xf32>
    %cst_37 = arith.constant dense<0.000000e+00> : vector<8x256xf32>
    %82 = tpu.matmul %80, %81, %cst_37 {dimension_numbers = #tpu.dot_dimension_numbers<[1], [0], [0], [1], [0, 0, 1, 1], [], []>} : vector<8x36xf32>, vector<36x256xf32>, vector<8x256xf32> -> vector<8x256xf32>
    %c0_38 = arith.constant 0 : index
    %c0_39 = arith.constant 0 : index
    %83 = vector.load %arg4[%c0_38, %c0_39] : memref<8x1xf32, #tpu.memory_space<vmem>>, vector<8x1xf32>
    %84 = vector.broadcast %83 : vector<8x1xf32> to vector<8x256xf32>
    %85 = arith.addf %82, %84 : vector<8x256xf32>
    %cst_40 = arith.constant 0.000000e+00 : f32
    %86 = vector.broadcast %cst_40 : f32 to vector<8x256xf32>
    %87 = arith.maximumf %85, %86 : vector<8x256xf32>
    %c0_41 = arith.constant 0 : index
    %c0_42 = arith.constant 0 : index
    %c0_43 = arith.constant 0 : index
    %88 = vector.load %arg5[%c0_41, %c0_42, %c0_43] : memref<1x8x256xf32, #tpu.memory_space<vmem>>, vector<1x8x256xf32>
    %89 = vector.shape_cast %88 : vector<1x8x256xf32> to vector<8x256xf32>
    %90 = vector.shape_cast %87 : vector<8x256xf32> to vector<1x8x256xf32>
    tpu.vector_store %arg5[%c0_41, %c0_42, %c0_43], %90 {strides = array<i32>} : memref<1x8x256xf32, #tpu.memory_space<vmem>>, vector<1x8x256xf32>,
    return
  }
  func.func @transform_0(%arg0: i32) -> (i32, i32) {
    %c0_i32 = arith.constant 0 : i32
    %c0_i32_0 = arith.constant 0 : i32
    return %c0_i32, %arg0 : i32, i32
  }
  func.func @transform_1(%arg0: i32) -> (i32, i32) {
    %c0_i32 = arith.constant 0 : i32
    %c0_i32_0 = arith.constant 0 : i32
    return %c0_i32, %arg0 : i32, i32
  }
  func.func @transform_2(%arg0: i32) -> (i32, i32) {
    %c0_i32 = arith.constant 0 : i32
    %c0_i32_0 = arith.constant 0 : i32
    %c0_i32_1 = arith.constant 0 : i32
    return %c0_i32, %c0_i32_0 : i32, i32
  }
  func.func @transform_3(%arg0: i32) -> (i32, i32) {
    %c0_i32 = arith.constant 0 : i32
    %c0_i32_0 = arith.constant 0 : i32
    %c0_i32_1 = arith.constant 0 : i32
    return %c0_i32, %c0_i32_0 : i32, i32
  }
  func.func @transform_4(%arg0: i32) -> (i32, i32, i32) {
    %c0_i32 = arith.constant 0 : i32
    %c0_i32_0 = arith.constant 0 : i32
    %c0_i32_1 = arith.constant 0 : i32
    return %arg0, %c0_i32, %c0_i32_0 : i32, i32, i32
  }
}

</mosaic_0001>

<bundles_post_ra>
// kernel: tpu_custom_call.1
= control target key start
LH: loop header
LB: loop body
LE: loop exit
PB: predicated region body
PF: predicated region fallthrough
CT: control target
= control target key end

     0   :  { %9 = vsyncpa [#allocation4], 0  ;;  %s1198_s0 = inlined_call_operand.hbm [shape: f32[4,512], index: 0, kind: input, shape index: {}]   ;;  %s1199_s1 = inlined_call_operand.vmem [shape: s32[2,512], index: 1, kind: input, shape index: {}]   ;;  %s1200_s2 = inlined_call_operand.vmem [shape: f32[8,36], index: 2, kind: input, shape index: {}]   ;;  %s1201_s3 = inlined_call_operand.vmem [shape: f32[8,1], index: 3, kind: input, shape index: {}]   ;;  %s1202_s4 = inlined_call_operand.hbm [shape: f32[2,8,256], index: 4, kind: output, shape index: {}]  }
   0x1   :  { %11 = vsyncpa [#allocation4 + $0x1], 0 }
   0x2   :  { %12 = vsyncpa [#allocation5], 0 }
   0x3   :  { %14 = vsyncpa [#allocation5 + $0x1], 0  ;;  %s879_s15 = smov 0   ;;  %s881_s16 = smov 0  }
   0x4   :  { %s883_s17 = smov 0   ;;  %s885_s18 = smov 0  }
   0x5 LB: > { %s900_s19 = sadd.s32 4294967295, %s840_s18   ;;  %s656_s20 = sadd.s32 4294967294, %s840_s18   ;;  %s840_s18 = sphi %s885_s18, %s1239_s18   ;;  %s836_s17 = sphi %s883_s17, %s1238_s17   ;;  %s832_s16 = sphi %s881_s16, %s1237_s16   ;;  %s828_s15 = sphi %s879_s15, %s1236_s15  }
   0x6   : > { %s904_s21 = sadd.s32 1, %s840_s18   ;;  %s27_s22 = sadd.s32 1, %s836_s17 }
   0x7   : > { %s24_s23 = ssub.s32 %s840_s18, %s904_s21  ;;  %p34_p0 = scmp.ne.s32.totalorder %s836_s17, %s832_s16 }
   0x8   : > { %p25_p1 = scmp.eq.s32.totalorder %s24_s23, 0  ;;  %p35_p2 = scmp.eq.s32.totalorder %s840_s18, 0 }
   0x9   : > { %p40_p3 = scmp.ne.s32.totalorder %s832_s16, %s828_s15  ;;  %p41_p4 = scmp.eq.s32.totalorder %s900_s19, 0 }
   0xa   : > { %s916_s24 = scalar_select %p25_p1, %s836_s17, %s27_s22  }
   0xb   : > { %p918_p5 = por %p35_p2, %p34_p0  ;;  %p922_p6 = por %p41_p4, %p40_p3 }
   0xc   : > { %p132_p7 = scmp.eq.s32.totalorder %s900_s19, 1  ;;  %p138_p8 = scmp.eq.s32.totalorder %s656_s20, 1 }
   0xd   : > { %p698_p10 = scmp.lt.s32.totalorder %s840_s18, 2  ;;  %s164_s29 = sand.u32 1, %s836_s17  }
   0xe   : > { %p929_p11 = por %p132_p7, %p34_p0  ;;  %p933_p12 = por %p138_p8, %p40_p3 }
   0xf   : > { %s676_s30 = sshll.u32 %s840_s18, 7  ;;  %s659_s5 = sshll.u32 %s164_s29, 3 }
  0x10   : > { %s1206_s27 = scalar_select %p929_p11, 1, 0 }
  0x11   : > { %s1207_s28 = scalar_select %p933_p12, 1, 0 }
  0x12   : > { %s942_s8 = scalar_lea.hbm %s1198_s0, %s676_s30  ;;  %s168_s9 = scalar_lea.vmem [#allocation3], %s659_s5 }
  0x13   : > { %s176_s10 = sshll.u32 %s168_s9, 4  ;;  %p946_p13 = pnand %p698_p10, %p918_p5  ;;  %s950_s10 = int_to_ptr.vmem [resolvable:$true] %s176_s10 }
  0x14   : > { %s165_s12 = scalar_lea.sflag [#allocation4], %s164_s29  ;;  %s744_s13 = scalar_lea.hbm %s942_s8, 128 }
  0x15   : > { %p745_p2 = scmp.ne.s32.totalorder %s942_s8, %s744_s13  ;;  %p746_p3 = pneg %p946_p13 }
  0x16   : > { %s749_s22 = scalar_lea.hbm %s1198_s0, 256  ;;  %p750_p5 = scmp.lt.u32.totalorder %s942_s8, %s1198_s0 }
  0x17   : > { %p747_p4 = pnand %p746_p3, %p745_p2  ;;  %p751_p8 = scmp.lt.u32.totalorder %s749_s22, %s744_s13 }
  0x18   : > { %p753_p9 = scmp.lt.u32.totalorder %s744_s13, %s942_s8 }
  0x19   : > { %p748_p7 = pneg %p747_p4  ;;  %p752_p10 = por %p751_p8, %p750_p5 }
  0x1b   : > { %p754_p0 = por %p753_p9, %p752_p10 }
  0x1d   : > { %p755_p1 = pnand %p754_p0, %p748_p7 }
  0x1f   : > { %758 = shalt.err (!%p755_p1)
}
  0x20   : > { %s759_s29 = scalar_lea.vmem %s950_s10, 128  ;;  %s842_s30 = smov [#allocation3]  }
  0x21   : > { %p760_p2 = scmp.ne.s32.totalorder %s950_s10, %s759_s29  ;;  %s764_s5 = sshll.u32 %s842_s30, 4  ;;  %s765_s5 = int_to_ptr.vmem [resolvable:$false] %s764_s5 }
  0x22   : > { %s766_s6 = scalar_lea.vmem %s765_s5, 256  ;;  %p767_p11 = scmp.lt.s32.totalorder %s950_s10, %s765_s5 }
  0x23   : > { %p762_p4 = pnand %p760_p2, %p746_p3  ;;  %p768_p5 = scmp.lt.s32.totalorder %s766_s6, %s759_s29 }
  0x25   : > { %p763_p12 = pneg %p762_p4  ;;  %p769_p8 = por %p768_p5, %p767_p11 }
  0x27   : > { %p770_p9 = pnand %p769_p8, %p763_p12 }
  0x29   : > { %773 = shalt.err (!%p770_p9)
}
  0x2a   : > { %693 = dma.hbm_to_vmem [thread:$0]  (!%p946_p13), %s942_s8, 128, %s950_s10, %s165_s12  }
  0x2b   : > { %p1209_p0 = scmp.lt.s32.totalorder %s840_s18, 3  ;;  %p1210_p1 = scmp.ge.s32.totalorder %s840_s18, 1 }
  0x2d   : > { %p191_p3 = pnand %p1210_p1, %p1209_p0 }
  0x2e   : > { %s984_s7 = sand.u32 (!%p191_p3), 1, %s832_s16  }
  0x2f   : > { %194 = sbr.rel (%p191_p3) target bundleno = 445 (0x1bd), region = 36  ;;  %s663_s9 = sshll.u32 (!%p191_p3), %s984_s7, 3 }
  0x30   : > { %s197_s13 = scalar_lea.sflag (!%p191_p3), [#allocation4], %s984_s7  ;;  %s200_s14 = scalar_lea.vmem (!%p191_p3), [#allocation3], %s663_s9 }
  0x36   : > { %819 = dma.done.wait (%p922_p6), %s197_s13, 128  }
  0x37   : > { %821 = vsyncadd (%p922_p6), %s197_s13, 4294967168  ;;  %v843_v0 = vmov 0   ;;  %v237_v1 = vld [vmem:[%s200_s14] sm:$0xff]  ;;  %s844_s8 = smov 1   ;;  %s845_s10 = smov 16   ;;  %v852_v3 = vmov 0.0   ;;  %v248_v5 = vlaneseq }
  0x38   : > { %742 = vset.pattern.permute.xlu0 %v843_v0  ;;  %323 = vrot.lane.b32.xlu1 %v237_v1, %s844_s8  ;;  %351 = vst [vmem:[#allocation2 + $0x20] sm:$0xf] %v237_v1  ;;  %v242_v2 = vcombine.high %v237_v1, %v237_v1  ;;  %s846_s11 = smov 17   ;;  %s847_s12 = smov 15   ;;  %v467_v4 = vld [vmem:[%s1201_s3] sm:$0xff] }
  0x39   : > { %271 = vrot.lane.b32.xlu0 %v237_v1, %s845_s10  ;;  %s848_s26 = smov 127   ;;  %s849_s20 = smov 112   ;;  %548 = vmatprep.mubr.f32.mxu0 %v852_v3  ;;  %v258_v8 = vshrl.u32 %v248_v5, 7  ;;  %v1016_v12 = vand.u32 127, %v248_v5 }
  0x3a   : > { %352 = vst [vmem:[#allocation2 + $0x28] sm:$0xf] %v242_v2  ;;  %s850_s22 = smov 113   ;;  %s851_s23 = smov 111  }
  0x3b   : > { %s665_s30 = sshll.u32 %s900_s19, 1  ;;  %v1006_v9 = vsub.s32 0, %v258_v8  ;;  %v1008_v10 = vsub.s32 1, %v258_v8  ;;  %vm327_vm5 = vcmp.lt.s32.totalorder %v1016_v12, 1  ;;  %vm250_vm8 = vcmp.lt.s32.totalorder %v1016_v12, 17  ;;  %s560_s25 = scalar_lea.sflag [#allocation5], %s984_s7 }
  0x3c   : > { %325 = vrot.lane.b32.xlu1 %v242_v2, %s844_s8  ;;  %p232_p6 = scmp.lt.s32.totalorder %s665_s30, 3  ;;  %vm275_vm9 = vcmp.lt.s32.totalorder %v1016_v12, 16  ;;  %vm303_vm15 = vcmp.lt.s32.totalorder %v1016_v12, 15  ;;  %p1233_p12 = scmp.ne.s32.totalorder %s1206_s27, 0 }
  0x3d   : > { %244 = vrot.lane.b32.xlu0 %v237_v1, %s846_s11 }
  0x3e   : > { %s1241_s30 = smov (!%p232_p6, %s665_s30), 3 }
  0x3f   : > { %s666_s5 = sshll.u32 %s1241_s30, 1 }
  0x40   : > { %246 = vrot.lane.b32.xlu1 %v242_v2, %s846_s11  ;;  %s235_s13 = scalar_lea.vmem %s1199_s1, %s666_s5  ;;  %s677_s11 = sshll.u32 %s900_s19, 8 }
  0x41   : > { %273 = vrot.lane.b32.xlu0 %v242_v2, %s845_s10  ;;  %v1000_v6 = vld [vmem:[%s235_s13 + $0x1] ss:$2 sm:$0x3]  ;;  %v1002_v7 = vld [vmem:[%s235_s13] ss:$2 sm:$0x3] }
  0x42   : > { %vm254_vm0 = vcmp.ge.s32.totalorder %v1000_v6, 1  ;;  %vm253_vm1 = vcmp.ge.s32.totalorder %v1002_v7, 1  ;;  %vm306_vm2 = vcmp.lt.s32.totalorder %v1000_v6, 15  ;;  %vm388_vm10 = vcmp.lt.s32.totalorder %v1002_v7, 15  ;;  %s664_s10 = sshll.u32 %s984_s7, 4  ;;  %s853_s19 = smov [#allocation6]  }
  0x43   : > { %v330_v11 = vsel %vm254_vm0, 1, %v843_v0  ;;  %vm255_vm3 = vmand %vm253_vm1, %vm254_vm0  ;;  %v278_v13 = vsel %vm253_vm1, 1, %v843_v0  ;;  %v360_v32 = vsel %vm306_vm2, 1, %v843_v0  ;;  %v412_v45 = vsel %vm388_vm10, 1, %v843_v0  ;;  %s778_s30 = sshll.u32 %s853_s19, 4  ;;  %s779_s30 = int_to_ptr.vmem [resolvable:$false] %s778_s30 }
  0x44   : > { %301 = vrot.lane.b32.xlu1 %v242_v2, %s847_s12  ;;  %vm307_vm4 = vmand %vm253_vm1, %vm306_vm2  ;;  %v334_v14 = vrot.slane %v330_v11, %v1006_v9  ;;  %v338_v15 = vrot.slane %v330_v11, %v1008_v10  ;;  %v256_v16 = vsel %vm255_vm3, 1, %v843_v0  ;;  %v282_v19 = vrot.slane %v278_v13, %v1006_v9  ;;  %s780_s5 = scalar_lea.vmem %s779_s30, 512 }
  0x45   : > { %299 = vrot.lane.b32.xlu0 %v237_v1, %s847_s12  ;;  %v308_v20 = vsel %vm307_vm4, 1, %v843_v0  ;;  %v260_v21 = vrot.slane %v256_v16, %v1006_v9  ;;  %v264_v22 = vrot.slane %v256_v16, %v1008_v10  ;;  %v286_v25 = vrot.slane %v278_v13, %v1008_v10  ;;  %vm389_vm4 = vmand %vm388_vm10, %vm254_vm0  ;;  %s229_s12 = scalar_lea.vmem [#allocation6], %s664_s10 }
  0x46   : > { %vm1029_vm6 = vcmp.eq.s32.totalorder %v334_v14, 1  ;;  %vm1033_vm7 = vcmp.eq.s32.totalorder %v338_v15, 1  ;;  %v312_v28 = vrot.slane %v308_v20, %v1006_v9  ;;  %vm1042_vm11 = vcmp.eq.s32.totalorder %v282_v19, 1 }
  0x47   : > { %vm1053_vm12 = vcmp.eq.s32.totalorder %v260_v21, 1  ;;  %vm1057_vm13 = vcmp.eq.s32.totalorder %v264_v22, 1  ;;  %vm1061_vm14 = vcmp.eq.s32.totalorder %v286_v25, 1  ;;  %v316_v40 = vrot.slane %v308_v20, %v1008_v10 }
  0x48   : > { %355 = vrot.lane.b32.xlu1 %v242_v2, %s848_s26  ;;  %vm1067_vm1 = vcmp.eq.s32.totalorder %v312_v28, 1  ;;  %v364_v44 = vrot.slane %v360_v32, %v1006_v9  ;;  %v368_v56 = vrot.slane %v360_v32, %v1008_v10  ;;  %v416_v63 = vrot.slane %v412_v45, %v1006_v9 }
  0x49   : > { %353 = vrot.lane.b32.xlu0 %v237_v1, %s848_s26  ;;  %vm318_vm3 = vcmp.eq.s32.totalorder %v316_v40, 1  ;;  %s574_s26 = sshll.u32 %s229_s12, 4  ;;  %s1156_s26 = int_to_ptr.vmem [resolvable:$true] %s574_s26 }
  0x4a   : > { %vm369_vm0 = vcmp.eq.s32.totalorder %v364_v44, 1  ;;  %s774_s29 = scalar_lea.vmem %s1156_s26, 256  ;;  %p781_p10 = scmp.lt.s32.totalorder %s1156_s26, %s779_s30 }
  0x4b   : > { %p775_p11 = scmp.ne.s32.totalorder %s1156_s26, %s774_s29  ;;  %p782_p2 = scmp.lt.s32.totalorder %s780_s5, %s774_s29 }
  0x4c   : > { %407 = vrot.lane.b32.xlu1 %v242_v2, %s849_s20 }
  0x4d   : > { %405 = vrot.lane.b32.xlu0 %v237_v1, %s849_s20  ;;  %p776_p13 = pnand %p775_p11, %p1233_p12  ;;  %p783_p4 = por %p782_p2, %p781_p10 }
  0x4f   : > { %p777_p7 = pneg %p776_p13 }
  0x50   : > { %383 = vrot.lane.b32.xlu1 %v242_v2, %s850_s22 }
  0x51   : > { %381 = vrot.lane.b32.xlu0 %v237_v1, %s850_s22  ;;  %p784_p5 = pnand %p783_p4, %p777_p7 }
  0x54   : > { %435 = vrot.lane.b32.xlu1 %v242_v2, %s851_s23  ;;  %v420_v2 = vrot.slane %v412_v45, %v1008_v10 }
  0x55   : > { %433 = vrot.lane.b32.xlu0 %v237_v1, %s851_s23  ;;  %v390_v1 = vsel %vm389_vm4, 1, %v843_v0  ;;  %s1154_s23 = scalar_lea.hbm %s1202_s4, %s677_s11 }
  0x56   : > { %v394_v11 = vrot.slane %v390_v1, %v1006_v9  ;;  %v398_v13 = vrot.slane %v390_v1, %v1008_v10 }
  0x59   : > { %470 = vperm.xlu0 %742, %v467_v4  }
  0xaa   : > { %v324_v17 = vpop.permute.xlu1 %323 }
  0xab   : > { %v272_v18 = vpop.permute.xlu0 %271 }
  0xae   : > { %v326_v27 = vpop.permute.xlu1 %325 }
  0xaf   : > { %v245_v26 = vpop.permute.xlu0 %244  ;;  %v328_v29 = vsel %vm327_vm5, %v324_v17, %v326_v27  ;;  %v329_v30 = vsel %vm327_vm5, %v326_v27, %v324_v17  ;;  %vm357_vm5 = vcmp.lt.s32.totalorder %v1016_v12, 127 }
  0xb0   : > { %v341_v33 = vsel %vm1029_vm6, %v329_v30, 0.0  ;;  %v342_v34 = vsel %vm1033_vm7, %v328_v29, 0.0  ;;  %vm370_vm6 = vcmp.eq.s32.totalorder %v368_v56, 1  ;;  %vm440_vm7 = vmand %vm388_vm10, %vm306_vm2  ;;  %vm385_vm2 = vcmp.lt.s32.totalorder %v1016_v12, 113 }
  0xb1   : > { %v345_v37 = vrot.slane %v341_v33, 4  ;;  %v346_v38 = vrot.slane %v342_v34, 4  ;;  %v441_v7 = vsel %vm440_vm7, 1, %v843_v0  ;;  %vm1123_vm10 = vcmp.eq.s32.totalorder %v394_v11, 1 }
  0xb2   : > { %v247_v41 = vpop.permute.xlu1 %246  ;;  %v445_v30 = vrot.slane %v441_v7, %v1006_v9  ;;  %v449_v31 = vrot.slane %v441_v7, %v1008_v10 }
  0xb3   : > { %v274_v42 = vpop.permute.xlu0 %273  ;;  %349 = vst [vmem:[#allocation2 + $0x10] sm:$0xf0] %v345_v37  ;;  %350 = vst [vmem:[#allocation2 + $0x18] sm:$0xf0] %v346_v38  ;;  %v251_v46 = vsel %vm250_vm8, %v245_v26, %v247_v41  ;;  %v252_v47 = vsel %vm250_vm8, %v247_v41, %v245_v26  ;;  %vm409_vm8 = vcmp.lt.s32.totalorder %v1016_v12, 112 }
  0xb4   : > { %v276_v48 = vsel %vm275_vm9, %v272_v18, %v274_v42  ;;  %v277_v49 = vsel %vm275_vm9, %v274_v42, %v272_v18  ;;  %v267_v50 = vsel %vm1053_vm12, %v252_v47, 0.0  ;;  %v268_v51 = vsel %vm1057_vm13, %v251_v46, 0.0 }
  0xb5   : > { %v289_v52 = vsel %vm1042_vm11, %v277_v49, 0.0  ;;  %v290_v53 = vsel %vm1061_vm14, %v276_v48, 0.0  ;;  %269 = vst [vmem:[#allocation2] sm:$0xf] %v267_v50  ;;  %270 = vst [vmem:[#allocation2 + $0x8] sm:$0xf] %v268_v51 }
  0xb6   : > { %v293_v54 = vrot.slane %v289_v52, 4  ;;  %v294_v55 = vrot.slane %v290_v53, 4  ;;  %v302_v57 = vpop.permute.xlu1 %301  ;;  %vm1113_vm9 = vcmp.eq.s32.totalorder %v416_v63, 1  ;;  %vm1117_vm11 = vcmp.eq.s32.totalorder %v420_v2, 1  ;;  %v456_v53 = vld [vmem:[%s1200_s2] sm:$0xff] }
  0xb7   : > { %v300_v58 = vpop.permute.xlu0 %299  ;;  %vm1127_vm12 = vcmp.eq.s32.totalorder %v398_v13, 1  ;;  %vm437_vm13 = vcmp.lt.s32.totalorder %v1016_v12, 111  ;;  %vm450_vm14 = vcmp.eq.s32.totalorder %v445_v30, 1 }
  0xb8   : > { %297 = vst [vmem:[#allocation2] sm:$0xf0] %v293_v54  ;;  %298 = vst [vmem:[#allocation2 + $0x8] sm:$0xf0] %v294_v55  ;;  %v304_v59 = vsel %vm303_vm15, %v300_v58, %v302_v57  ;;  %v305_v60 = vsel %vm303_vm15, %v302_v57, %v300_v58  ;;  %vm451_vm15 = vcmp.eq.s32.totalorder %v449_v31, 1 }
  0xb9   : > { %v319_v61 = vsel %vm1067_vm1, %v305_v60, 0.0  ;;  %v320_v62 = vsel %vm318_vm3, %v304_v59, 0.0  ;;  %vm477_vm1 = vcmask 1043456   ;;  %vm473_vm3 = vcmask 293888  }
  0xba   : > { %321 = vst [vmem:[#allocation2 + $0x10] sm:$0xf] %v319_v61  ;;  %322 = vst [vmem:[#allocation2 + $0x18] sm:$0xf] %v320_v62  ;;  %v356_v3 = vpop.permute.xlu1 %355 }
  0xbb   : > { %v354_v4 = vpop.permute.xlu0 %353 }
  0xbc   : > { %v358_v5 = vsel %vm357_vm5, %v354_v4, %v356_v3  ;;  %v359_v8 = vsel %vm357_vm5, %v356_v3, %v354_v4 }
  0xbd   : > { %v371_v14 = vsel %vm369_vm0, %v358_v5, 0.0  ;;  %v372_v15 = vsel %vm370_vm6, %v359_v8, 0.0 }
  0xbe   : > { %v375_v17 = vrot.slane %v371_v14, 4  ;;  %v376_v18 = vrot.slane %v372_v15, 4  ;;  %v408_v19 = vpop.permute.xlu1 %407 }
  0xbf   : > { %v406_v20 = vpop.permute.xlu0 %405  ;;  %v458_v25 = vld [vmem:[#allocation2 + $0x8] sm:$0xff]  ;;  %v457_v28 = vld [vmem:[#allocation2] sm:$0xff] }
  0xc0   : > { %379 = vst [vmem:[#allocation2 + $0x20] sm:$0xf0] %v375_v17  ;;  %380 = vst [vmem:[#allocation2 + $0x28] sm:$0xf0] %v376_v18  ;;  %v410_v21 = vsel %vm409_vm8, %v406_v20, %v408_v19  ;;  %v411_v22 = vsel %vm409_vm8, %v408_v19, %v406_v20 }
  0xc1   : > { %v423_v0 = vsel %vm1113_vm9, %v410_v21, 0.0  ;;  %v424_v26 = vsel %vm1117_vm11, %v411_v22, 0.0  ;;  %v460_v27 = vld [vmem:[#allocation2 + $0x18] sm:$0xff]  ;;  %v459_v29 = vld [vmem:[#allocation2 + $0x10] sm:$0xff] }
  0xc2   : > { %v427_v32 = vrot.slane %v423_v0, 4  ;;  %v428_v33 = vrot.slane %v424_v26, 4  ;;  %v678_v34 = vpack.c.bf16 %v460_v27, %v458_v25  ;;  %v680_v35 = vpack.c.bf16 %v459_v29, %v457_v28  ;;  %v384_v36 = vpop.permute.xlu1 %383 }
  0xc3   : > { %v382_v37 = vpop.permute.xlu0 %381 }
  0xc4   : > { %431 = vst [vmem:[#allocation2 + $0x30] sm:$0xf0] %v427_v32  ;;  %432 = vst [vmem:[#allocation2 + $0x38] sm:$0xf0] %v428_v33  ;;  %v386_v38 = vsel %vm385_vm2, %v382_v37, %v384_v36  ;;  %v387_v39 = vsel %vm385_vm2, %v384_v36, %v382_v37  ;;  %679 = vmatprep.subr.bf16.mxu0 %v678_v34 }
  0xc5   : > { %v401_v9 = vsel %vm1123_vm10, %v386_v38, 0.0  ;;  %v402_v10 = vsel %vm1127_vm12, %v387_v39, 0.0  ;;  %681 = vmatpush1.bf16.msra.mxu0 %v680_v35 }
  0xc6   : > { %403 = vst [vmem:[#allocation2 + $0x30] sm:$0xf] %v401_v9  ;;  %404 = vst [vmem:[#allocation2 + $0x38] sm:$0xf] %v402_v10  ;;  %v436_v40 = vpop.permute.xlu1 %435 }
  0xc7   : > { %v434_v41 = vpop.permute.xlu0 %433  ;;  %v462_v46 = vld [vmem:[#allocation2 + $0x28] sm:$0xff]  ;;  %v461_v48 = vld [vmem:[#allocation2 + $0x20] sm:$0xff] }
  0xc8   : > { %v438_v42 = vsel %vm437_vm13, %v434_v41, %v436_v40  ;;  %v439_v43 = vsel %vm437_vm13, %v436_v40, %v434_v41 }
  0xc9   : > { %v452_v44 = vsel %vm450_vm14, %v438_v42, 0.0  ;;  %v453_v45 = vsel %vm451_vm15, %v439_v43, 0.0 }
  0xca   : > { %454 = vst [vmem:[#allocation2 + $0x40] sm:$0xf] %v452_v44  ;;  %455 = vst [vmem:[#allocation2 + $0x48] sm:$0xf] %v453_v45 }
  0xcd   : > { %v464_v47 = vld [vmem:[#allocation2 + $0x38] sm:$0xff]  ;;  %v463_v49 = vld [vmem:[#allocation2 + $0x30] sm:$0xff] }
  0xce   : > { %v682_v50 = vpack.c.bf16 %v464_v47, %v462_v46  ;;  %v684_v51 = vpack.c.bf16 %v463_v49, %v461_v48 }
  0xd0   : > { %683 = vmatprep.subr.bf16.mxu0 %v682_v50 }
  0xd1   : > { %685 = vmatpush1.bf16.msra.mxu0 %v684_v51  ;;  %v466_v12 = vld [vmem:[#allocation2 + $0x48] sm:$0xf]  ;;  %v465_v52 = vld [vmem:[#allocation2 + $0x40] sm:$0xf] }
  0xd2   : > { %668 = vmatprep.subr.msk.mxu0 %vm477_vm1, %v466_v12 }
  0xd5   : > { %669 = vmatpush1.msk.msra.mxu0 %vm477_vm1, %v465_v52 }
  0xd6   : > { %670 = vmatmul.mubr.msk.f32.vlgmr.msra.gmra.mrb[0].mxu0 %vm473_vm3, %v456_v53 }
  0xd8   : > { %v471_v54 = vpop.permute.xlu0 %470 }
 0x1a9   : > { %v550_v55 = vpop.f32.mrb[0].mxu0 }
 0x1aa   : > { %v551_v56 = vadd.f32 %v550_v55, %v471_v54  ;;  %v552_v57 = vpop.f32.mrb[1].mxu0 }
 0x1ab   : > { %v553_v58 = vadd.f32 %v552_v57, %v471_v54 }
 0x1ac   : > { %v555_v59 = vmax.f32 %v551_v56, 0.0 }
 0x1ad   : > { %v556_v60 = vmax.f32 %v553_v58, 0.0 }
 0x1ae   : > { %557 = vst [vmem:[%s229_s12] sm:$0xff] %v555_v59 }
 0x1af   : > { %558 = vst [vmem:[%s229_s12 + $0x8] sm:$0xff] %v556_v60 }
 0x1b0   : > { %787 = shalt.err (!%p784_p5)
}
 0x1b1   : > { %s788_s7 = scalar_lea.hbm %s1154_s23, 256  ;;  %s792_s13 = scalar_lea.hbm %s1202_s4, 512 }
 0x1b2   : > { %p789_p8 = scmp.ne.s32.totalorder %s1154_s23, %s788_s7  ;;  %p793_p1 = scmp.lt.u32.totalorder %s1154_s23, %s1202_s4 }
 0x1b3   : > { %p794_p3 = scmp.lt.u32.totalorder %s792_s13, %s788_s7  ;;  %p796_p11 = scmp.lt.u32.totalorder %s788_s7, %s1154_s23 }
 0x1b4   : > { %p790_p9 = pnand %p789_p8, %p1233_p12 }
 0x1b5   : > { %p795_p6 = por %p794_p3, %p793_p1 }
 0x1b6   : > { %p791_p0 = pneg %p790_p9 }
 0x1b7   : > { %p797_p13 = por %p796_p11, %p795_p6 }
 0x1b9   : > { %p798_p7 = pnand %p797_p13, %p791_p0 }
 0x1bb   : > { %801 = shalt.err (!%p798_p7)
}
 0x1bc   : > { %688 = dma.vmem_to_hbm [thread:$0]  (%p1233_p12), %s1156_s26, 256, %s1154_s23, %s560_s25  }
 0x1bd PF: > { %s586_s10 = sand.u32 1, %s828_s15   ;;  %p1234_p10 = scmp.ne.s32.totalorder %s1207_s28, 0 }
 0x1be   : > { %p1235_p2 = scmp.ge.s32.totalorder %s840_s18, 2  ;;  %s587_s11 = scalar_lea.sflag [#allocation5], %s586_s10 }
 0x1c0   : > { %p695_p4 = pnand %p1235_p2, %p1234_p10 }
 0x1c2   : > { %823 = dma.done.wait (!%p695_p4), %s587_s11, 256  }
 0x1c3   : > { %825 = vsyncadd (!%p695_p4), %s587_s11, 4294967040  ;;  %p17_p5 = scmp.ge.s32.totalorder %s904_s21, 4   ;;  %s1236_s15 = smov %s832_s16 }
 0x1c4   : > { %s1237_s16 = smov %s836_s17  ;;  %s1238_s17 = smov %s916_s24 }
 0x1c5   : > { %s1239_s18 = smov %s904_s21  ;;  %19 = sbr.rel (!%p17_p5) target bundleno = 5 (0x5), region = 85 }
 0x1cc   :  { %592 = vsyncpa [#allocation4], 1 }
 0x1cd   :  { %594 = vsyncpa [#allocation4 + $0x1], 1 }
 0x1ce   :  { %595 = vsyncpa [#allocation5], 1 }
 0x1cf   :  { %597 = vsyncpa [#allocation5 + $0x1], 1 }

</bundles_post_ra>
